<compile_context>
chip_gen: v7x
topology: tpu7x:2x2x1
jax: 0.10.0
libtpu: 0.0.40
codegen_flags: <defaults>
</compile_context>

<pallas_src>
import functools

import jax
import jax.numpy as jnp
from jax import lax
from jax.experimental import pallas as pl
from jax.experimental.pallas import tpu as pltpu

# --- hyper-parameters (the global R dict in the original script) -------------
R = {"TxNN_seq_len_FFE": 8}

IN_CH = 1                       # self.in_dim
OUT_CH = 2                      # self.out_dim
K = R["TxNN_seq_len_FFE"]       # self.seqLen (conv kernel width / # FFE taps)


def _round_up(x, m):
    return ((x + m - 1) // m) * m


def _choose_tiles(batch, seq_len, l_out, itemsize=4, *, max_tile=1024,
                  vmem_budget=16 << 20):
    """Pick (tile_b, sub_b, per_row_bytes) for the batch grid."""
    l_pad = _round_up(seq_len, 128)
    lo_pad = _round_up(l_out, 128)
    # lane-padded bytes moved per batch row (input row + output row)
    per_row_bytes = (l_pad + 2 * lo_pad) * itemsize

    # Batch tile: large enough to amortize the ~0.35 us per-grid-step overhead,
    # >= 2 grid steps when possible (v7x megacore), capped so the double-buffered
    # in+out tiles stay within a budget that fits every generation's scoped VMEM
    # (v5e 16 MiB default, v7x 32 MiB default / 64 MiB physical).
    cap = max(8, vmem_budget // (2 * per_row_bytes))
    tile_b = max(8, min(-(-batch // 2), max_tile, cap))

    # Rows processed per inner fori_loop step: keep the live values
    # (x sub-block + 2 f32 accumulators) within ~half the 64-vreg file.
    sub_b = max(8, min(64, tile_b, (128 * 1024 // per_row_bytes) // 8 * 8))
    tile_b = _round_up(tile_b, sub_b)
    return tile_b, sub_b, per_row_bytes


def _ffe_kernel(x_ref, w_ref, b_ref, o_ref, *, sub_b, num_taps, l_out, l_out_pad):
    """x_ref: [tile_b, L] (VMEM); w_ref: [2, K] (SMEM); b_ref: [2] (SMEM);
    o_ref: [tile_b, 2*l_out_pad] (VMEM), row b = [ch0 times | ch1 times]."""
    n_sub = x_ref.shape[0] // sub_b

    def body(s, carry):
        r0 = pl.multiple_of(s * sub_b, sub_b)
        rows = pl.ds(r0, sub_b)
        # One sub-block load; per-tap shifted static slices of an in-vreg value
        # lower to lane rotates/selects (XLU slot has slack) rather than DMAs.
        xw = x_ref[rows, :]                               # [sub_b, L]
        # Bias folded into tap 0.
        x0 = xw[:, 0:l_out]
        acc0 = w_ref[0, 0] * x0 + b_ref[0]
        acc1 = w_ref[1, 0] * x0 + b_ref[1]
        # Remaining taps, statically unrolled (K is tiny). Pure VPU MACs with
        # SMEM scalar splats; f32 accumulation.
        for k in range(1, num_taps):
            xs = xw[:, k:k + l_out]
            acc0 = acc0 + w_ref[0, k] * xs
            acc1 = acc1 + w_ref[1, k] * xs
        # Dense full-sublane stores; channel 1 starts at a 128-aligned lane offset.
        o_ref[rows, pl.ds(0, l_out)] = acc0.astype(o_ref.dtype)
        o_ref[rows, pl.ds(l_out_pad, l_out)] = acc1.astype(o_ref.dtype)
        return carry

    # fori_loop (not a Python for) so live ranges stay bounded at large tiles.
    lax.fori_loop(0, n_sub, body, 0, unroll=False)


@jax.jit
def txnn_ffe_forward(x, w, b):
    """x: [B, 1, L] (or [B, L]), w: [2, 1, K] (or [2, K]), b: [2] -> [B*L_out, 2]."""
    if x.ndim == 3:
        x = x[:, 0, :]                               # single input channel
    if w.ndim == 3:
        w = w[:, 0, :]
    B, L = x.shape
    k = w.shape[-1]
    l_out = L - k + 1
    l_out_pad = _round_up(l_out, 128)                # keep channel-1 lane offset aligned

    tile_b, sub_b, per_row_bytes = _choose_tiles(B, L, l_out, x.dtype.itemsize)

    grid_b = pl.cdiv(B, tile_b)
    b_pad = grid_b * tile_b
    if b_pad != B:                                   # tail handling: pad batch, slice later
        x = jnp.pad(x, ((0, b_pad - B), (0, 0)))

    # Explicit scoped-VMEM limit (double-buffered in+out tiles + headroom),
    # clamped to stay inside v7x's 64 MiB physical VMEM.
    working = 2 * tile_b * per_row_bytes
    vmem_limit = int(min(48 << 20, max(8 << 20, 2 * working)))

    cost = pl.CostEstimate(
        flops=2 * b_pad * OUT_CH * l_out * k,
        transcendentals=0,
        bytes_accessed=int((b_pad * L + b_pad * 2 * l_out_pad + w.size + b.size)
                           * x.dtype.itemsize),
    )

    kernel = functools.partial(_ffe_kernel, sub_b=sub_b, num_taps=int(k),
                               l_out=int(l_out), l_out_pad=int(l_out_pad))

    xx = pl.pallas_call(
        kernel,
        out_shape=jax.ShapeDtypeStruct((b_pad, 2 * l_out_pad), jnp.float32),
        grid=(grid_b,),
        in_specs=[
            # Batch tile of x, auto double-buffered across the grid.
            pl.BlockSpec((tile_b, L), lambda i: (i, 0)),
            # Tiny weights/bias: whole arrays resident in SMEM for all steps.
            pl.BlockSpec(memory_space=pltpu.MemorySpace.SMEM),
            pl.BlockSpec(memory_space=pltpu.MemorySpace.SMEM),
        ],
        # Lane-dense output tile: row b = [ch0 | ch1], width 2*l_out_pad lanes.
        out_specs=pl.BlockSpec((tile_b, 2 * l_out_pad), lambda i: (i, 0)),
        compiler_params=pltpu.CompilerParams(
            dimension_semantics=("parallel",),
            vmem_limit_bytes=vmem_limit),
        cost_estimate=cost,
    )(x, w, b)

    # Drop batch / lane padding; xx row b = concat(ch0 times, ch1 times) is the
    # row-major flatten of [B, 2, L_out], so the module's .reshape(-1, 2) is
    # semantically unchanged.
    xx = xx[:B].reshape(B, OUT_CH, l_out_pad)[:, :, :l_out]   # [B, 2, L_out]
    # NOTE: consumers that can accept the lane-dense [B, 2, L_out] form should
    # use it directly; the 2-wide minor dim below forces an XLA relayout copy.
    return xx.reshape(-1, OUT_CH)


def txnn_ffe_reference(x, w, b):
    """Pure-JAX reference for nn.Conv1d(1, 2, K, bias=True) + reshape(-1, 2)."""
    x2 = x[:, 0, :] if x.ndim == 3 else x            # [B, L]
    w2 = w[:, 0, :] if w.ndim == 3 else w            # [2, K]
    k = w2.shape[-1]
    l_out = x2.shape[1] - k + 1
    cols = jnp.stack([x2[:, i:i + l_out] for i in range(k)], axis=-1)  # [B, L_out, K]
    xx = jnp.einsum("blk,ck->bcl", cols, w2) + b[None, :, None]        # [B, 2, L_out]
    return xx.reshape(-1, OUT_CH)


def init_params(key):
    # Deterministic synthetic init (PyTorch Conv1d default uniform bound).
    kw, kb = jax.random.split(key)
    bound = 1.0 / jnp.sqrt(IN_CH * K)
    w = jax.random.uniform(kw, (OUT_CH, IN_CH, K), jnp.float32, -bound, bound)
    b = jax.random.uniform(kb, (OUT_CH,), jnp.float32, -bound, bound)
    return w, b


if __name__ == "__main__":
    key = jax.random.PRNGKey(0)
    k_x, k_p = jax.random.split(key)

    # Small shapes consistent with the module: [batch, in_dim=1, seq].
    # L = 135 with K = 8 taps -> L_out = 128 (exactly lane-dense output slabs);
    # B = 12 is not a tile multiple -> exercises padding + a 2-step parallel grid.
    B, L = 12, 135
    x = jax.random.normal(k_x, (B, IN_CH, L), jnp.float32)
    w, b = init_params(k_p)

    out = txnn_ffe_forward(x, w, b)
    out = jax.block_until_ready(out)

    ref = txnn_ffe_reference(x, w, b)
    assert out.shape == (B * (L - K + 1), OUT_CH), out.shape
    assert jnp.allclose(out, ref, atol=1e-5, rtol=1e-5), "mismatch vs pure-JAX reference"

    print("KERNEL_OK")
</pallas_src>

<mosaic_0001>
module attributes {stable_mosaic.version = 11 : i64} {
  func.func @_ffe_kernel(%arg0: i32, %arg1: memref<8x135xf32, #tpu.memory_space<vmem>>, %arg2: memref<2x8xf32, #tpu.memory_space<smem>>, %arg3: memref<2xf32, #tpu.memory_space<smem>>, %arg4: memref<8x256xf32, #tpu.memory_space<vmem>>) attributes {dimension_semantics = [#tpu.dimension_semantics<parallel>], iteration_bounds = array<i64: 2>, scalar_prefetch = 0 : i64, scratch_operands = 0 : i64, tpu.core_type = #tpu.core_type<tc>, window_params = [{transform_indices = @transform_0, window_bounds = array<i64: 8, 135>}, {transform_indices = @transform_1, window_bounds = array<i64: 2, 8>}, {transform_indices = @transform_2, window_bounds = array<i64: 2>}, {transform_indices = @transform_3, window_bounds = array<i64: 8, 256>}]} {
    %c0_i32 = arith.constant 0 : i32
    %c8_i32 = arith.constant 8 : i32
    %0 = arith.muli %c0_i32, %c8_i32 : i32
    %1 = tpu.assume_multiple %0, 8 : i32
    %2 = arith.index_cast %1 : i32 to index
    %c0 = arith.constant 0 : index
    %3 = vector.load %arg1[%2, %c0] : memref<8x135xf32, #tpu.memory_space<vmem>>, vector<8x135xf32>
    %4 = vector.extract_strided_slice %3 {offsets = [0, 0], sizes = [8, 128], strides = [1, 1]} : vector<8x135xf32> to vector<8x128xf32>
    %c0_0 = arith.constant 0 : index
    %c0_1 = arith.constant 0 : index
    %5 = memref.load %arg2[%c0_0, %c0_1] : memref<2x8xf32, #tpu.memory_space<smem>>
    %6 = vector.broadcast %5 : f32 to vector<8x128xf32>
    %7 = arith.mulf %6, %4 : vector<8x128xf32>
    %c0_2 = arith.constant 0 : index
    %8 = memref.load %arg3[%c0_2] : memref<2xf32, #tpu.memory_space<smem>>
    %9 = vector.broadcast %8 : f32 to vector<8x128xf32>
    %10 = arith.addf %7, %9 : vector<8x128xf32>
    %c1 = arith.constant 1 : index
    %c0_3 = arith.constant 0 : index
    %11 = memref.load %arg2[%c1, %c0_3] : memref<2x8xf32, #tpu.memory_space<smem>>
    %12 = vector.broadcast %11 : f32 to vector<8x128xf32>
    %13 = arith.mulf %12, %4 : vector<8x128xf32>
    %c1_4 = arith.constant 1 : index
    %14 = memref.load %arg3[%c1_4] : memref<2xf32, #tpu.memory_space<smem>>
    %15 = vector.broadcast %14 : f32 to vector<8x128xf32>
    %16 = arith.addf %13, %15 : vector<8x128xf32>
    %17 = vector.extract_strided_slice %3 {offsets = [0, 1], sizes = [8, 128], strides = [1, 1]} : vector<8x135xf32> to vector<8x128xf32>
    %c0_5 = arith.constant 0 : index
    %c1_6 = arith.constant 1 : index
    %18 = memref.load %arg2[%c0_5, %c1_6] : memref<2x8xf32, #tpu.memory_space<smem>>
    %19 = vector.broadcast %18 : f32 to vector<8x128xf32>
    %20 = arith.mulf %19, %17 : vector<8x128xf32>
    %21 = arith.addf %10, %20 : vector<8x128xf32>
    %c1_7 = arith.constant 1 : index
    %c1_8 = arith.constant 1 : index
    %22 = memref.load %arg2[%c1_7, %c1_8] : memref<2x8xf32, #tpu.memory_space<smem>>
    %23 = vector.broadcast %22 : f32 to vector<8x128xf32>
    %24 = arith.mulf %23, %17 : vector<8x128xf32>
    %25 = arith.addf %16, %24 : vector<8x128xf32>
    %26 = vector.extract_strided_slice %3 {offsets = [0, 2], sizes = [8, 128], strides = [1, 1]} : vector<8x135xf32> to vector<8x128xf32>
    %c0_9 = arith.constant 0 : index
    %c2 = arith.constant 2 : index
    %27 = memref.load %arg2[%c0_9, %c2] : memref<2x8xf32, #tpu.memory_space<smem>>
    %28 = vector.broadcast %27 : f32 to vector<8x128xf32>
    %29 = arith.mulf %28, %26 : vector<8x128xf32>
    %30 = arith.addf %21, %29 : vector<8x128xf32>
    %c1_10 = arith.constant 1 : index
    %c2_11 = arith.constant 2 : index
    %31 = memref.load %arg2[%c1_10, %c2_11] : memref<2x8xf32, #tpu.memory_space<smem>>
    %32 = vector.broadcast %31 : f32 to vector<8x128xf32>
    %33 = arith.mulf %32, %26 : vector<8x128xf32>
    %34 = arith.addf %25, %33 : vector<8x128xf32>
    %35 = vector.extract_strided_slice %3 {offsets = [0, 3], sizes = [8, 128], strides = [1, 1]} : vector<8x135xf32> to vector<8x128xf32>
    %c0_12 = arith.constant 0 : index
    %c3 = arith.constant 3 : index
    %36 = memref.load %arg2[%c0_12, %c3] : memref<2x8xf32, #tpu.memory_space<smem>>
    %37 = vector.broadcast %36 : f32 to vector<8x128xf32>
    %38 = arith.mulf %37, %35 : vector<8x128xf32>
    %39 = arith.addf %30, %38 : vector<8x128xf32>
    %c1_13 = arith.constant 1 : index
    %c3_14 = arith.constant 3 : index
    %40 = memref.load %arg2[%c1_13, %c3_14] : memref<2x8xf32, #tpu.memory_space<smem>>
    %41 = vector.broadcast %40 : f32 to vector<8x128xf32>
    %42 = arith.mulf %41, %35 : vector<8x128xf32>
    %43 = arith.addf %34, %42 : vector<8x128xf32>
    %44 = vector.extract_strided_slice %3 {offsets = [0, 4], sizes = [8, 128], strides = [1, 1]} : vector<8x135xf32> to vector<8x128xf32>
    %c0_15 = arith.constant 0 : index
    %c4 = arith.constant 4 : index
    %45 = memref.load %arg2[%c0_15, %c4] : memref<2x8xf32, #tpu.memory_space<smem>>
    %46 = vector.broadcast %45 : f32 to vector<8x128xf32>
    %47 = arith.mulf %46, %44 : vector<8x128xf32>
    %48 = arith.addf %39, %47 : vector<8x128xf32>
    %c1_16 = arith.constant 1 : index
    %c4_17 = arith.constant 4 : index
    %49 = memref.load %arg2[%c1_16, %c4_17] : memref<2x8xf32, #tpu.memory_space<smem>>
    %50 = vector.broadcast %49 : f32 to vector<8x128xf32>
    %51 = arith.mulf %50, %44 : vector<8x128xf32>
    %52 = arith.addf %43, %51 : vector<8x128xf32>
    %53 = vector.extract_strided_slice %3 {offsets = [0, 5], sizes = [8, 128], strides = [1, 1]} : vector<8x135xf32> to vector<8x128xf32>
    %c0_18 = arith.constant 0 : index
    %c5 = arith.constant 5 : index
    %54 = memref.load %arg2[%c0_18, %c5] : memref<2x8xf32, #tpu.memory_space<smem>>
    %55 = vector.broadcast %54 : f32 to vector<8x128xf32>
    %56 = arith.mulf %55, %53 : vector<8x128xf32>
    %57 = arith.addf %48, %56 : vector<8x128xf32>
    %c1_19 = arith.constant 1 : index
    %c5_20 = arith.constant 5 : index
    %58 = memref.load %arg2[%c1_19, %c5_20] : memref<2x8xf32, #tpu.memory_space<smem>>
    %59 = vector.broadcast %58 : f32 to vector<8x128xf32>
    %60 = arith.mulf %59, %53 : vector<8x128xf32>
    %61 = arith.addf %52, %60 : vector<8x128xf32>
    %62 = vector.extract_strided_slice %3 {offsets = [0, 6], sizes = [8, 128], strides = [1, 1]} : vector<8x135xf32> to vector<8x128xf32>
    %c0_21 = arith.constant 0 : index
    %c6 = arith.constant 6 : index
    %63 = memref.load %arg2[%c0_21, %c6] : memref<2x8xf32, #tpu.memory_space<smem>>
    %64 = vector.broadcast %63 : f32 to vector<8x128xf32>
    %65 = arith.mulf %64, %62 : vector<8x128xf32>
    %66 = arith.addf %57, %65 : vector<8x128xf32>
    %c1_22 = arith.constant 1 : index
    %c6_23 = arith.constant 6 : index
    %67 = memref.load %arg2[%c1_22, %c6_23] : memref<2x8xf32, #tpu.memory_space<smem>>
    %68 = vector.broadcast %67 : f32 to vector<8x128xf32>
    %69 = arith.mulf %68, %62 : vector<8x128xf32>
    %70 = arith.addf %61, %69 : vector<8x128xf32>
    %71 = vector.extract_strided_slice %3 {offsets = [0, 7], sizes = [8, 128], strides = [1, 1]} : vector<8x135xf32> to vector<8x128xf32>
    %c0_24 = arith.constant 0 : index
    %c7 = arith.constant 7 : index
    %72 = memref.load %arg2[%c0_24, %c7] : memref<2x8xf32, #tpu.memory_space<smem>>
    %73 = vector.broadcast %72 : f32 to vector<8x128xf32>
    %74 = arith.mulf %73, %71 : vector<8x128xf32>
    %75 = arith.addf %66, %74 : vector<8x128xf32>
    %c1_25 = arith.constant 1 : index
    %c7_26 = arith.constant 7 : index
    %76 = memref.load %arg2[%c1_25, %c7_26] : memref<2x8xf32, #tpu.memory_space<smem>>
    %77 = vector.broadcast %76 : f32 to vector<8x128xf32>
    %78 = arith.mulf %77, %71 : vector<8x128xf32>
    %79 = arith.addf %70, %78 : vector<8x128xf32>
    %80 = arith.index_cast %1 : i32 to index
    %c0_27 = arith.constant 0 : index
    %81 = vector.load %arg4[%80, %c0_27] : memref<8x256xf32, #tpu.memory_space<vmem>>, vector<8x128xf32>
    tpu.vector_store %arg4[%80, %c0_27], %75 {strides = array<i32>} : memref<8x256xf32, #tpu.memory_space<vmem>>, vector<8x128xf32>,
    %82 = arith.index_cast %1 : i32 to index
    %c128 = arith.constant 128 : index
    %83 = vector.load %arg4[%82, %c128] : memref<8x256xf32, #tpu.memory_space<vmem>>, vector<8x128xf32>
    tpu.vector_store %arg4[%82, %c128], %79 {strides = array<i32>} : memref<8x256xf32, #tpu.memory_space<vmem>>, vector<8x128xf32>,
    %c1_i32 = arith.constant 1 : i32
    return
  }
  func.func @transform_0(%arg0: i32) -> (i32, i32) {
    %c0_i32 = arith.constant 0 : i32
    %c0_i32_0 = arith.constant 0 : i32
    return %arg0, %c0_i32 : i32, i32
  }
  func.func @transform_1(%arg0: i32) -> (i32, i32) {
    %c0_i32 = arith.constant 0 : i32
    %c0_i32_0 = arith.constant 0 : i32
    %c0_i32_1 = arith.constant 0 : i32
    return %c0_i32, %c0_i32_0 : i32, i32
  }
  func.func @transform_2(%arg0: i32) -> i32 {
    %c0_i32 = arith.constant 0 : i32
    %c0_i32_0 = arith.constant 0 : i32
    return %c0_i32 : i32
  }
  func.func @transform_3(%arg0: i32) -> (i32, i32) {
    %c0_i32 = arith.constant 0 : i32
    %c0_i32_0 = arith.constant 0 : i32
    return %arg0, %c0_i32 : i32, i32
  }
}

</mosaic_0001>

<bundles_post_ra>
// kernel: txnn_ffe_forward.1
= control target key start
LH: loop header
LB: loop body
LE: loop exit
PB: predicated region body
PF: predicated region fallthrough
CT: control target
= control target key end

     0   :  { %8 = vsyncpa [#allocation3], 0  ;;  %s736_s0 = inlined_call_operand.vmem [shape: f32[16,135], index: 0, kind: input, shape index: {}]   ;;  %s737_s1 = inlined_call_operand.vmem [shape: f32[2,8], index: 1, kind: input, shape index: {}]   ;;  %s738_s2 = inlined_call_operand.vmem [shape: f32[2], index: 2, kind: input, shape index: {}]   ;;  %s739_s3 = inlined_call_operand.vmem [shape: f32[16,256], index: 3, kind: output, shape index: {}]  }
   0x1   :  { %9 = vsyncpa [#allocation5], 0  ;;  %s629_s12 = smov 0  }
   0x2 LB: > { %s635_s13 = sadd.s32 4294967295, %s598_s12   ;;  %p487_p0 = scmp.ge.s32.totalorder %s598_s12, 1  ;;  %s598_s12 = sphi %s629_s12, %s15_s12  }
   0x3   : > { %p114_p1 = scmp.lt.s32.totalorder %s598_s12, 3  ;;  %s127_s16 = sshll.u32 %s737_s1, 4  ;;  %s128_s16 = int_to_ptr.vmem [resolvable:$true] %s127_s16 }
   0x4   : > { %p740_p3 = scmp.eq.s32.totalorder %s635_s13, 0  ;;  %s138_s20 = sshll.u32 %s738_s2, 4  ;;  %s139_s20 = int_to_ptr.vmem [resolvable:$true] %s138_s20 }
   0x5   : > { %p642_p2 = pnand %p487_p0, %p114_p1  ;;  %s554_s22 = scalar_lea.vmem %s128_s16, 32 }
   0x6   : > { %p555_p6 = scmp.ne.s32.totalorder %s128_s16, %s554_s22  ;;  %p562_p10 = scmp.lt.s32.totalorder %s128_s16, %s128_s16 }
   0x7   : > { %s742_s17 = scalar_select %p642_p2, 1, 0 }
   0x8   : > { %p526_p4 = pneg %p642_p2  ;;  %p563_p11 = scmp.lt.s32.totalorder %s554_s22, %s554_s22 }
   0xa   : > { %p654_p5 = pnand %p740_p3, %p526_p4  ;;  %p564_p12 = por %p563_p11, %p562_p10 }
   0xc   : > { %p556_p7 = pneg %p654_p5 }
   0xe   : > { %p557_p8 = pnand %p556_p7, %p555_p6 }
  0x10   : > { %p558_p9 = pneg %p557_p8 }
  0x12   : > { %p565_p13 = pnand %p564_p12, %p558_p9 }
  0x14   : > { %568 = shalt.err (!%p565_p13)
}
  0x15   : > { %s600_s23 = smov [#allocation2]   ;;  %s569_s24 = scalar_lea.vmem %s139_s20, 16 }
  0x16   : > { %529 = dma.vmem_to_smem (!%p654_p5), %s128_s16, 32, %s600_s23, [#allocation3]  }
  0x17   : > { %p570_p0 = scmp.ne.s32.totalorder %s139_s20, %s569_s24  ;;  %p577_p3 = scmp.lt.s32.totalorder %s139_s20, %s139_s20 }
  0x18   : > { %p578_p2 = scmp.lt.s32.totalorder %s569_s24, %s569_s24 }
  0x19   : > { %p572_p1 = pnand %p570_p0, %p556_p7 }
  0x1a   : > { %p579_p6 = por %p578_p2, %p577_p3 }
  0x1b   : > { %p573_p4 = pneg %p572_p1 }
  0x1d   : > { %p580_p8 = pnand %p579_p6, %p573_p4 }
  0x1f   : > { %583 = shalt.err (!%p580_p8)
}
  0x20   : > { %s601_s25 = smov [#allocation4]   ;;  %p744_p9 = scmp.ne.s32.totalorder %s742_s17, 0 }
  0x21   : > { %532 = dma.vmem_to_smem (!%p654_p5), %s139_s20, 16, %s601_s25, [#allocation5]  }
  0x22   : > { %159 = sbr.rel (%p744_p9) target bundleno = 229 (0xe5), region = 32  ;;  %p745_p10 = scmp.eq.s32.totalorder (!%p744_p9), %s635_s13, 0 }
  0x29   : > { %589 = dma.done.wait (%p745_p10), [#allocation3], 32   ;;  %p746_p11 = pmov %p745_p10 }
  0x2a   : > { %p747_p7 = pmov %p745_p10 }
  0x2b   : > { %591 = vsyncadd (%p746_p11), [#allocation3], 4294967264 }
  0x2c   : > { %593 = dma.done.wait (%p747_p7), [#allocation5], 16   ;;  %p748_p2 = pmov %p747_p7 }
  0x2e   : > { %595 = vsyncadd (%p748_p2), [#allocation5], 4294967280 }
  0x2f   : > { %169 = sfence }
  0x30   : > { %p188_p3 = scmp.lt.s32.totalorder %s635_s13, 1  ;;  %s501_s26 = sld [smem:[#allocation2 + $0x81]]  ;;  %vm225_vm0 = vcmask 1039360   ;;  %vm252_vm1 = vcmask 1031168   ;;  %vm279_vm2 = vcmask 1022976   ;;  %vm306_vm3 = vcmask 1014784  }
  0x31   : > { %s500_s27 = sld [smem:[#allocation2 + $0x1]]  ;;  %s502_s28 = sld [smem:[#allocation2 + $0x2]]  ;;  %vm333_vm4 = vcmask 1006592   ;;  %vm360_vm5 = vcmask 998400   ;;  %vm387_vm6 = vcmask 990208  }
  0x32   : > { %s750_s13 = smov (!%p188_p3, %s635_s13), 1  ;;  %s503_s6 = sld [smem:[#allocation2 + $0x82]] }
  0x33   : > { %s516_s29 = sshll.u32 %s750_s13, 4  ;;  %s602_s7 = smov 127  }
  0x34   : > { %s192_s5 = scalar_lea.vmem %s736_s0, %s516_s29  ;;  %s504_s8 = sld [smem:[#allocation2 + $0x3]] }
  0x35   : > { %v684_v0 = vld [vmem:[%s192_s5] sm:$0xff]  ;;  %v686_v1 = vld [vmem:[%s192_s5 + $0x8] sm:$0xff]  ;;  %s505_s9 = sld [smem:[#allocation2 + $0x83]]  ;;  %s603_s10 = smov 126  }
  0x36   : > { %v230_v2 = vstv %s501_s26  ;;  %s506_s11 = sld [smem:[#allocation2 + $0x4]]  ;;  %s604_s15 = smov 125  }
  0x37   : > { %v216_v3 = vstv %s500_s27  ;;  %v231_v4 = vmul.f32 %v230_v2, %v684_v0  ;;  %v232_v6 = vmul.f32 %v230_v2, %v686_v1  ;;  %v243_v8 = vstv %s502_s28  ;;  %s507_s14 = sld [smem:[#allocation2 + $0x84]]  ;;  %s508_s16 = sld [smem:[#allocation2 + $0x5]] }
  0x38   : > { %v217_v5 = vmul.f32 %v216_v3, %v684_v0  ;;  %v218_v7 = vmul.f32 %v216_v3, %v686_v1  ;;  %v245_v9 = vmul.f32 %v243_v8, %v686_v1  ;;  %v244_v10 = vmul.f32 %v243_v8, %v684_v0  ;;  %s509_s17 = sld [smem:[#allocation2 + $0x85]]  ;;  %s605_s18 = smov 124  }
  0x39   : > { %235 = vrot.lane.b32.xlu1 %v231_v4, %s602_s7  ;;  %v257_v11 = vstv %s503_s6  ;;  %s510_s19 = sld [smem:[#allocation2 + $0x6]]  ;;  %s606_s21 = smov 123  }
  0x3a   : > { %221 = vrot.lane.b32.xlu0 %v217_v5, %s602_s7  ;;  %v259_v12 = vmul.f32 %v257_v11, %v686_v1  ;;  %v258_v13 = vmul.f32 %v257_v11, %v684_v0  ;;  %v270_v14 = vstv %s504_s8  ;;  %s511_s20 = sld [smem:[#allocation2 + $0x86]]  ;;  %s512_s22 = sld [smem:[#allocation2 + $0x7]] }
  0x3b   : > { %v272_v15 = vmul.f32 %v270_v14, %v686_v1  ;;  %v271_v16 = vmul.f32 %v270_v14, %v684_v0  ;;  %v284_v17 = vstv %s505_s9  ;;  %s513_s23 = sld [smem:[#allocation2 + $0x87]]  ;;  %s607_s24 = smov 122  }
  0x3c   : > { %v286_v18 = vmul.f32 %v284_v17, %v686_v1  ;;  %v285_v19 = vmul.f32 %v284_v17, %v684_v0  ;;  %v297_v20 = vstv %s506_s11  ;;  %s608_s25 = smov 121   ;;  %s203_s26 = sld [smem:[#allocation2]] }
  0x3d   : > { %237 = vrot.lane.b32.xlu1 %v232_v6, %s602_s7  ;;  %v299_v21 = vmul.f32 %v297_v20, %v686_v1  ;;  %v298_v22 = vmul.f32 %v297_v20, %v684_v0  ;;  %v311_v23 = vstv %s507_s14  ;;  %v324_v26 = vstv %s508_s16  ;;  %s498_s27 = sld [smem:[#allocation2 + $0x80]]  ;;  %s499_s30 = sld [smem:[#allocation4 + $0x1]] }
  0x3e   : > { %223 = vrot.lane.b32.xlu0 %v218_v7, %s602_s7  ;;  %v313_v24 = vmul.f32 %v311_v23, %v686_v1  ;;  %v312_v25 = vmul.f32 %v311_v23, %v684_v0  ;;  %v326_v27 = vmul.f32 %v324_v26, %v686_v1  ;;  %v325_v28 = vmul.f32 %v324_v26, %v684_v0  ;;  %s206_s28 = sld [smem:[#allocation4]]  ;;  %s197_s6 = scalar_lea.vmem %s739_s3, %s516_s29 }
  0x3f   : > { %v338_v29 = vstv %s509_s17  ;;  %v351_v32 = vstv %s510_s19 }
  0x40   : > { %v340_v30 = vmul.f32 %v338_v29, %v686_v1  ;;  %v339_v31 = vmul.f32 %v338_v29, %v684_v0  ;;  %v353_v33 = vmul.f32 %v351_v32, %v686_v1  ;;  %v352_v34 = vmul.f32 %v351_v32, %v684_v0 }
  0x41   : > { %250 = vrot.lane.b32.xlu1 %v245_v9, %s603_s10  ;;  %v365_v35 = vstv %s511_s20  ;;  %v378_v38 = vstv %s512_s22  ;;  %v392_v41 = vstv %s513_s23 }
  0x42   : > { %248 = vrot.lane.b32.xlu0 %v244_v10, %s603_s10  ;;  %v367_v36 = vmul.f32 %v365_v35, %v686_v1  ;;  %v366_v37 = vmul.f32 %v365_v35, %v684_v0  ;;  %v380_v39 = vmul.f32 %v378_v38, %v686_v1  ;;  %v379_v40 = vmul.f32 %v378_v38, %v684_v0 }
  0x43   : > { %v394_v42 = vmul.f32 %v392_v41, %v686_v1  ;;  %v393_v43 = vmul.f32 %v392_v41, %v684_v0  ;;  %v204_v58 = vstv %s203_s26  ;;  %v210_v62 = vstv %s498_s27 }
  0x44   : > { %v205_v61 = vmul.f32 %v204_v58, %v684_v0  ;;  %v207_v63 = vstv %s206_s28  ;;  %v211_v3 = vmul.f32 %v210_v62, %v684_v0  ;;  %v213_v5 = vstv %s499_s30 }
  0x45   : > { %264 = vrot.lane.b32.xlu1 %v259_v12, %s603_s10 }
  0x46   : > { %262 = vrot.lane.b32.xlu0 %v258_v13, %s603_s10  ;;  %v208_v4 = vadd.f32 %v207_v63, %v205_v61  ;;  %v214_v10 = vadd.f32 %v213_v5, %v211_v3 }
  0x49   : > { %277 = vrot.lane.b32.xlu1 %v272_v15, %s604_s15 }
  0x4a   : > { %275 = vrot.lane.b32.xlu0 %v271_v16, %s604_s15 }
  0x4d   : > { %291 = vrot.lane.b32.xlu1 %v286_v18, %s604_s15 }
  0x4e   : > { %289 = vrot.lane.b32.xlu0 %v285_v19, %s604_s15 }
  0x51   : > { %304 = vrot.lane.b32.xlu1 %v299_v21, %s605_s18 }
  0x52   : > { %302 = vrot.lane.b32.xlu0 %v298_v22, %s605_s18 }
  0x55   : > { %318 = vrot.lane.b32.xlu1 %v313_v24, %s605_s18 }
  0x56   : > { %316 = vrot.lane.b32.xlu0 %v312_v25, %s605_s18 }
  0x59   : > { %331 = vrot.lane.b32.xlu1 %v326_v27, %s606_s21 }
  0x5a   : > { %329 = vrot.lane.b32.xlu0 %v325_v28, %s606_s21 }
  0x5d   : > { %345 = vrot.lane.b32.xlu1 %v340_v30, %s606_s21 }
  0x5e   : > { %343 = vrot.lane.b32.xlu0 %v339_v31, %s606_s21 }
  0x61   : > { %358 = vrot.lane.b32.xlu1 %v353_v33, %s607_s24 }
  0x62   : > { %356 = vrot.lane.b32.xlu0 %v352_v34, %s607_s24 }
  0x65   : > { %372 = vrot.lane.b32.xlu1 %v367_v36, %s607_s24 }
  0x66   : > { %370 = vrot.lane.b32.xlu0 %v366_v37, %s607_s24 }
  0x69   : > { %385 = vrot.lane.b32.xlu1 %v380_v39, %s608_s25 }
  0x6a   : > { %383 = vrot.lane.b32.xlu0 %v379_v40, %s608_s25 }
  0x6d   : > { %399 = vrot.lane.b32.xlu1 %v394_v42, %s608_s25 }
  0x6e   : > { %397 = vrot.lane.b32.xlu0 %v393_v43, %s608_s25 }
  0xab   : > { %v236_v44 = vpop.permute.xlu1 %235 }
  0xac   : > { %v222_v45 = vpop.permute.xlu0 %221 }
  0xaf   : > { %v238_v46 = vpop.permute.xlu1 %237 }
  0xb0   : > { %v224_v47 = vpop.permute.xlu0 %223  ;;  %v239_v12 = vsel %vm225_vm0, %v236_v44, %v238_v46 }
  0xb1   : > { %v226_v6 = vsel %vm225_vm0, %v222_v45, %v224_v47  ;;  %v241_v18 = vadd.f32 %v239_v12, %v214_v10 }
  0xb2   : > { %v228_v11 = vadd.f32 %v226_v6, %v208_v4 }
  0xb3   : > { %v251_v48 = vpop.permute.xlu1 %250 }
  0xb4   : > { %v249_v49 = vpop.permute.xlu0 %248 }
  0xb5   : > { %v253_v9 = vsel %vm252_vm1, %v249_v49, %v251_v48 }
  0xb6   : > { %v255_v14 = vadd.f32 %v253_v9, %v228_v11 }
  0xb7   : > { %v265_v50 = vpop.permute.xlu1 %264 }
  0xb8   : > { %v263_v51 = vpop.permute.xlu0 %262 }
  0xb9   : > { %v266_v0 = vsel %vm252_vm1, %v263_v51, %v265_v50 }
  0xba   : > { %v268_v22 = vadd.f32 %v266_v0, %v241_v18 }
  0xbb   : > { %v278_v52 = vpop.permute.xlu1 %277 }
  0xbc   : > { %v276_v53 = vpop.permute.xlu0 %275 }
  0xbd   : > { %v280_v13 = vsel %vm279_vm2, %v276_v53, %v278_v52 }
  0xbe   : > { %v282_v19 = vadd.f32 %v280_v13, %v255_v14 }
  0xbf   : > { %v292_v54 = vpop.permute.xlu1 %291 }
  0xc0   : > { %v290_v55 = vpop.permute.xlu0 %289 }
  0xc1   : > { %v293_v20 = vsel %vm279_vm2, %v290_v55, %v292_v54 }
  0xc2   : > { %v295_v28 = vadd.f32 %v293_v20, %v268_v22 }
  0xc3   : > { %v305_v56 = vpop.permute.xlu1 %304 }
  0xc4   : > { %v303_v57 = vpop.permute.xlu0 %302 }
  0xc5   : > { %v307_v17 = vsel %vm306_vm3, %v303_v57, %v305_v56 }
  0xc6   : > { %v309_v23 = vadd.f32 %v307_v17, %v282_v19 }
  0xc7   : > { %v319_v59 = vpop.permute.xlu1 %318 }
  0xc8   : > { %v317_v60 = vpop.permute.xlu0 %316 }
  0xc9   : > { %v320_v26 = vsel %vm306_vm3, %v317_v60, %v319_v59 }
  0xca   : > { %v322_v31 = vadd.f32 %v320_v26, %v295_v28 }
  0xcb   : > { %v332_v1 = vpop.permute.xlu1 %331 }
  0xcc   : > { %v330_v2 = vpop.permute.xlu0 %329 }
  0xcd   : > { %v334_v21 = vsel %vm333_vm4, %v330_v2, %v332_v1 }
  0xce   : > { %v336_v29 = vadd.f32 %v334_v21, %v309_v23 }
  0xcf   : > { %v346_v7 = vpop.permute.xlu1 %345 }
  0xd0   : > { %v344_v8 = vpop.permute.xlu0 %343 }
  0xd1   : > { %v347_v30 = vsel %vm333_vm4, %v344_v8, %v346_v7 }
  0xd2   : > { %v349_v37 = vadd.f32 %v347_v30, %v322_v31 }
  0xd3   : > { %v359_v15 = vpop.permute.xlu1 %358 }
  0xd4   : > { %v357_v16 = vpop.permute.xlu0 %356 }
  0xd5   : > { %v361_v27 = vsel %vm360_vm5, %v357_v16, %v359_v15 }
  0xd6   : > { %v363_v32 = vadd.f32 %v361_v27, %v336_v29 }
  0xd7   : > { %v373_v24 = vpop.permute.xlu1 %372 }
  0xd8   : > { %v371_v25 = vpop.permute.xlu0 %370 }
  0xd9   : > { %v374_v35 = vsel %vm360_vm5, %v371_v25, %v373_v24 }
  0xda   : > { %v376_v39 = vadd.f32 %v374_v35, %v349_v37 }
  0xdb   : > { %v386_v33 = vpop.permute.xlu1 %385 }
  0xdc   : > { %v384_v34 = vpop.permute.xlu0 %383 }
  0xdd   : > { %v388_v36 = vsel %vm387_vm6, %v384_v34, %v386_v33 }
  0xde   : > { %v390_v38 = vadd.f32 %v388_v36, %v363_v32 }
  0xdf   : > { %v400_v40 = vpop.permute.xlu1 %399 }
  0xe0   : > { %406 = vst [vmem:[%s197_s6] sm:$0xff] %v390_v38  ;;  %v398_v41 = vpop.permute.xlu0 %397 }
  0xe1   : > { %v401_v42 = vsel %vm387_vm6, %v398_v41, %v400_v40 }
  0xe2   : > { %v403_v43 = vadd.f32 %v401_v42, %v376_v39 }
  0xe4   : > { %407 = vst [vmem:[%s197_s6 + $0x8] sm:$0xff] %v403_v43 }
  0xe5 PF: > { %s15_s12 = sadd.s32 1, %s598_s12  }
  0xe6   : > { %p12_p5 = scmp.ge.s32.totalorder %s15_s12, 4  }
  0xe8   :  { %14 = sbr.rel (!%p12_p5) target bundleno = 2 (0x2), region = 73 }
  0xef   :  { %429 = vsyncpa [#allocation3], 1 }
  0xf0   :  { %431 = vsyncpa [#allocation3 + $0x1], 1 }
  0xf1   :  { %432 = vsyncpa [#allocation5], 1 }

</bundles_post_ra>
